<compile_context>
chip_gen: v5e
topology: v5e:2x2
jax: 0.10.0
libtpu: 0.0.40
codegen_flags: <defaults>
</compile_context>

<pallas_src>
import functools

import jax
import jax.numpy as jnp
import numpy as np
from jax.experimental import pallas as pl
from jax.experimental.pallas import tpu as pltpu

# Model hyper-parameters (synthetic wrapped model).
C_IN = 4
C_OUT = 8
H = 16
W = 16
NUM_CLASSES = 10
KSIZE = 3

LANE = 128              # padded class width -> lane-dense output store
WCI = W * C_IN          # 64  : one input row, pixel-major / channel-minor
WCO = W * C_OUT         # 128 : one conv-output row, pixel-major / channel-minor
MAX_B_TILE = 256        # VMEM-safe on all generations (v5e 16 MiB scoped default)


def _model_fwd_kernel(x_ref, wb_ref, cb_ref, fw_ref, fb_ref, o_ref, xpad_ref):
    """Forward pass for one batch tile.

    x_ref   : (BT, H, W*C_IN)       rows of BT images, pixel-major / channel-minor
    wb_ref  : (3, W*C_IN, W*C_OUT)  banded conv weights, one per kh tap
    cb_ref  : (1, W*C_OUT)          conv bias tiled over W
    fw_ref  : (W*C_OUT, LANE)       FC weight (1/(H*W) pool scale folded in,
                                    classes zero-padded to 128 lanes)
    fb_ref  : (1, LANE)             FC bias (zero-padded)
    o_ref   : (BT, LANE)            logits (first NUM_CLASSES columns valid)
    xpad_ref: (BT, H+2, W*C_IN)     VMEM scratch, H-zero-padded copy of x
    """
    bt = x_ref.shape[0]

    # Zero-pad along H inside VMEM (no extra HBM copy of x in the wrapper).
    zrow = jnp.zeros((bt, 1, WCI), dtype=jnp.float32)
    xpad_ref[:, 0:1, :] = zrow
    xpad_ref[:, H + 1:H + 2, :] = zrow
    xpad_ref[:, 1:H + 1, :] = x_ref[...]

    # 3x3 "same" conv as 3 banded matmuls (one per kh tap).
    # M = bt*H (batch folded into M), K = 64, N = 128 (lane dense).
    # W-direction zero padding is encoded in the band structure of wb.
    acc = jnp.zeros((bt * H, WCO), dtype=jnp.float32)
    for kh in range(KSIZE):                      # static, fully unrolled
        lhs = xpad_ref[:, kh:kh + H, :].reshape(bt * H, WCI)
        acc += jnp.dot(lhs, wb_ref[kh], preferred_element_type=jnp.float32)

    # bias + ReLU on lane-dense (M, 128) tiles (broadcast hoisted once).
    acc = jnp.maximum(acc + cb_ref[...], 0.0)

    # Global average pool: sum over H here; the 1/(H*W) scale (and the sum
    # over W) are folded into fw, so no in-kernel divide is needed.
    pooled = jnp.sum(acc.reshape(bt, H, WCO), axis=1)             # (bt, 128)

    # FC head; classes padded to 128 lanes -> unmasked lane-dense store.
    logits = jnp.dot(pooled, fw_ref[...],
                     preferred_element_type=jnp.float32) + fb_ref[...]
    o_ref[...] = logits.astype(o_ref.dtype)


def _banded_conv_weights(conv_w):
    """(3,3,C_IN,C_OUT) -> (3, W*C_IN, W*C_OUT) banded per-kh matrices.

    wb[kh, p*C_IN+ci, j*C_OUT+co] = conv_w[kh, kw, ci, co] with p = j + kw - 1;
    out-of-range p is simply omitted, which implements zero 'same' padding
    along W for free.
    """
    sel = np.zeros((KSIZE, W, W), dtype=np.float32)
    for kw in range(KSIZE):
        for j in range(W):
            p = j + kw - 1
            if 0 <= p < W:
                sel[kw, p, j] = 1.0
    wb = jnp.einsum('kpj,hkio->hpijo', jnp.asarray(sel), conv_w)
    return wb.reshape(KSIZE, WCI, WCO)


@functools.partial(jax.jit, static_argnames=())
def model_trainer_forward(x_nchw, conv_w, conv_b, fc_w, fc_b):
    """Equivalent of ModelTrainer.forward(x): runs the wrapped model.

    x_nchw : (N, C_IN, H, W) float32  (PyTorch layout)
    returns: (N, NUM_CLASSES) float32 logits
    """
    n = x_nchw.shape[0]
    # NCHW -> NHWC -> (N, H, W*C_IN): pixel-major, channel-minor rows.
    x_rows = jnp.transpose(x_nchw, (0, 2, 3, 1)).reshape(n, H, WCI)

    # Tiny weight transforms (weight-only, fused into the jitted graph).
    wb = _banded_conv_weights(conv_w)                                # (3, 64, 128)
    cb = jnp.tile(conv_b, W).reshape(1, WCO)                         # (1, 128)
    fw = jnp.zeros((WCO, LANE), jnp.float32).at[:, :NUM_CLASSES].set(
        jnp.tile(fc_w, (W, 1)) / float(H * W))   # full 1/(H*W) pool folded in
    fb = jnp.zeros((1, LANE), jnp.float32).at[0, :NUM_CLASSES].set(fc_b)

    b_tile = min(n, MAX_B_TILE)
    grid = (pl.cdiv(n, b_tile),)

    out = pl.pallas_call(
        _model_fwd_kernel,
        out_shape=jax.ShapeDtypeStruct((n, LANE), jnp.float32),
        grid_spec=pltpu.PrefetchScalarGridSpec(
            num_scalar_prefetch=0,
            grid=grid,
            in_specs=[
                pl.BlockSpec((b_tile, H, WCI), lambda b: (b, 0, 0)),
                pl.BlockSpec((KSIZE, WCI, WCO), lambda b: (0, 0, 0)),
                pl.BlockSpec((1, WCO), lambda b: (0, 0)),
                pl.BlockSpec((WCO, LANE), lambda b: (0, 0)),
                pl.BlockSpec((1, LANE), lambda b: (0, 0)),
            ],
            out_specs=pl.BlockSpec((b_tile, LANE), lambda b: (b, 0)),
            scratch_shapes=[pltpu.VMEM((b_tile, H + 2, WCI), jnp.float32)],
        ),
        compiler_params=pltpu.CompilerParams(
            dimension_semantics=("parallel",)),
    )(x_rows, wb, cb, fw, fb)

    # Classes were zero-padded to 128 lanes for a dense store; slice back.
    return out[:, :NUM_CLASSES]


def _reference_forward(x_nchw, conv_w, conv_b, fc_w, fc_b):
    """Pure-JAX reference of the same wrapped model (for sanity check)."""
    x = jnp.transpose(x_nchw, (0, 2, 3, 1))                       # NHWC
    y = jax.lax.conv_general_dilated(
        x, conv_w, window_strides=(1, 1), padding="SAME",
        dimension_numbers=("NHWC", "HWIO", "NHWC"))
    y = jnp.maximum(y + conv_b, 0.0)
    pooled = jnp.mean(y, axis=(1, 2))                             # (N, C_OUT)
    return pooled @ fc_w + fc_b


if __name__ == "__main__":
    key = jax.random.PRNGKey(0)
    kx, kcw, kcb, kfw, kfb = jax.random.split(key, 5)

    # Deterministic synthetic parameters (no checkpoint loading).
    x = jax.random.normal(kx, (2, C_IN, H, W), dtype=jnp.float32)
    conv_w = 0.1 * jax.random.normal(kcw, (KSIZE, KSIZE, C_IN, C_OUT),
                                     dtype=jnp.float32)
    conv_b = 0.05 * jax.random.normal(kcb, (C_OUT,), dtype=jnp.float32)
    fc_w = 0.1 * jax.random.normal(kfw, (C_OUT, NUM_CLASSES),
                                   dtype=jnp.float32)
    fc_b = 0.05 * jax.random.normal(kfb, (NUM_CLASSES,), dtype=jnp.float32)

    logits = model_trainer_forward(x, conv_w, conv_b, fc_w, fc_b)
    jax.block_until_ready(logits)

    ref = _reference_forward(x, conv_w, conv_b, fc_w, fc_b)
    assert logits.shape == (2, NUM_CLASSES)
    assert jnp.allclose(logits, ref, atol=1e-4, rtol=1e-4)

    # TODO(synk): ModelTrainer's training loop, Adam optimizer state, DataLoader
    # plumbing and torch.save/load checkpoint IO are host-side orchestration
    # with no Pallas-kernel equivalent; only forward() is implemented here.
    print("KERNEL_OK")
</pallas_src>

<mosaic_0001>
module attributes {stable_mosaic.version = 11 : i64} {
  func.func @_model_fwd_kernel(%arg0: i32, %arg1: memref<2x16x64xf32, #tpu.memory_space<vmem>>, %arg2: memref<3x64x128xf32, #tpu.memory_space<vmem>>, %arg3: memref<1x128xf32, #tpu.memory_space<vmem>>, %arg4: memref<128x128xf32, #tpu.memory_space<vmem>>, %arg5: memref<1x128xf32, #tpu.memory_space<vmem>>, %arg6: memref<2x128xf32, #tpu.memory_space<vmem>>, %arg7: memref<2x18x64xf32, #tpu.memory_space<vmem>>) attributes {dimension_semantics = [#tpu.dimension_semantics<parallel>], iteration_bounds = array<i64: 1>, scalar_prefetch = 0 : i64, scratch_operands = 1 : i64, tpu.core_type = #tpu.core_type<tc>, window_params = [{transform_indices = @transform_0, window_bounds = array<i64: 2, 16, 64>}, {pipeline_mode = #tpu.pipeline_mode<synchronous>, transform_indices = @transform_1, window_bounds = array<i64: 3, 64, 128>}, {pipeline_mode = #tpu.pipeline_mode<synchronous>, transform_indices = @transform_2, window_bounds = array<i64: 1, 128>}, {pipeline_mode = #tpu.pipeline_mode<synchronous>, transform_indices = @transform_3, window_bounds = array<i64: 128, 128>}, {pipeline_mode = #tpu.pipeline_mode<synchronous>, transform_indices = @transform_4, window_bounds = array<i64: 1, 128>}, {transform_indices = @transform_5, window_bounds = array<i64: 2, 128>}]} {
    %cst = arith.constant 0.000000e+00 : f32
    %0 = vector.broadcast %cst : f32 to vector<2x1x64xf32>
    %c0 = arith.constant 0 : index
    %c0_0 = arith.constant 0 : index
    %c0_1 = arith.constant 0 : index
    %1 = vector.load %arg7[%c0, %c0_0, %c0_1] : memref<2x18x64xf32, #tpu.memory_space<vmem>>, vector<2x1x64xf32>
    tpu.vector_store %arg7[%c0, %c0_0, %c0_1], %0 {strides = array<i32>} : memref<2x18x64xf32, #tpu.memory_space<vmem>>, vector<2x1x64xf32>,
    %c0_2 = arith.constant 0 : index
    %c17 = arith.constant 17 : index
    %c0_3 = arith.constant 0 : index
    %2 = vector.load %arg7[%c0_2, %c17, %c0_3] : memref<2x18x64xf32, #tpu.memory_space<vmem>>, vector<2x1x64xf32>
    tpu.vector_store %arg7[%c0_2, %c17, %c0_3], %0 {strides = array<i32>} : memref<2x18x64xf32, #tpu.memory_space<vmem>>, vector<2x1x64xf32>,
    %c0_4 = arith.constant 0 : index
    %c0_5 = arith.constant 0 : index
    %c0_6 = arith.constant 0 : index
    %3 = vector.load %arg1[%c0_4, %c0_5, %c0_6] : memref<2x16x64xf32, #tpu.memory_space<vmem>>, vector<2x16x64xf32>
    %c0_7 = arith.constant 0 : index
    %c1 = arith.constant 1 : index
    %c0_8 = arith.constant 0 : index
    %4 = vector.load %arg7[%c0_7, %c1, %c0_8] : memref<2x18x64xf32, #tpu.memory_space<vmem>>, vector<2x16x64xf32>
    tpu.vector_store %arg7[%c0_7, %c1, %c0_8], %3 {strides = array<i32>} : memref<2x18x64xf32, #tpu.memory_space<vmem>>, vector<2x16x64xf32>,
    %cst_9 = arith.constant 0.000000e+00 : f32
    %5 = vector.broadcast %cst_9 : f32 to vector<32x128xf32>
    %c0_10 = arith.constant 0 : index
    %c0_11 = arith.constant 0 : index
    %c0_12 = arith.constant 0 : index
    %6 = vector.load %arg7[%c0_10, %c0_11, %c0_12] : memref<2x18x64xf32, #tpu.memory_space<vmem>>, vector<2x16x64xf32>
    %7 = vector.shape_cast %6 : vector<2x16x64xf32> to vector<32x64xf32>
    %c0_13 = arith.constant 0 : index
    %c0_14 = arith.constant 0 : index
    %c0_15 = arith.constant 0 : index
    %8 = vector.load %arg2[%c0_13, %c0_14, %c0_15] : memref<3x64x128xf32, #tpu.memory_space<vmem>>, vector<1x64x128xf32>
    %9 = vector.shape_cast %8 : vector<1x64x128xf32> to vector<64x128xf32>
    %cst_16 = arith.constant dense<0.000000e+00> : vector<32x128xf32>
    %10 = tpu.matmul %7, %9, %cst_16 {dimension_numbers = #tpu.dot_dimension_numbers<[1], [0], [0], [1], [0, 0, 1, 1], [], []>} : vector<32x64xf32>, vector<64x128xf32>, vector<32x128xf32> -> vector<32x128xf32>
    %11 = arith.addf %5, %10 : vector<32x128xf32>
    %c0_17 = arith.constant 0 : index
    %c1_18 = arith.constant 1 : index
    %c0_19 = arith.constant 0 : index
    %12 = vector.load %arg7[%c0_17, %c1_18, %c0_19] : memref<2x18x64xf32, #tpu.memory_space<vmem>>, vector<2x16x64xf32>
    %13 = vector.shape_cast %12 : vector<2x16x64xf32> to vector<32x64xf32>
    %c1_20 = arith.constant 1 : index
    %c0_21 = arith.constant 0 : index
    %c0_22 = arith.constant 0 : index
    %14 = vector.load %arg2[%c1_20, %c0_21, %c0_22] : memref<3x64x128xf32, #tpu.memory_space<vmem>>, vector<1x64x128xf32>
    %15 = vector.shape_cast %14 : vector<1x64x128xf32> to vector<64x128xf32>
    %cst_23 = arith.constant dense<0.000000e+00> : vector<32x128xf32>
    %16 = tpu.matmul %13, %15, %cst_23 {dimension_numbers = #tpu.dot_dimension_numbers<[1], [0], [0], [1], [0, 0, 1, 1], [], []>} : vector<32x64xf32>, vector<64x128xf32>, vector<32x128xf32> -> vector<32x128xf32>
    %17 = arith.addf %11, %16 : vector<32x128xf32>
    %c0_24 = arith.constant 0 : index
    %c2 = arith.constant 2 : index
    %c0_25 = arith.constant 0 : index
    %18 = vector.load %arg7[%c0_24, %c2, %c0_25] : memref<2x18x64xf32, #tpu.memory_space<vmem>>, vector<2x16x64xf32>
    %19 = vector.shape_cast %18 : vector<2x16x64xf32> to vector<32x64xf32>
    %c2_26 = arith.constant 2 : index
    %c0_27 = arith.constant 0 : index
    %c0_28 = arith.constant 0 : index
    %20 = vector.load %arg2[%c2_26, %c0_27, %c0_28] : memref<3x64x128xf32, #tpu.memory_space<vmem>>, vector<1x64x128xf32>
    %21 = vector.shape_cast %20 : vector<1x64x128xf32> to vector<64x128xf32>
    %cst_29 = arith.constant dense<0.000000e+00> : vector<32x128xf32>
    %22 = tpu.matmul %19, %21, %cst_29 {dimension_numbers = #tpu.dot_dimension_numbers<[1], [0], [0], [1], [0, 0, 1, 1], [], []>} : vector<32x64xf32>, vector<64x128xf32>, vector<32x128xf32> -> vector<32x128xf32>
    %23 = arith.addf %17, %22 : vector<32x128xf32>
    %c0_30 = arith.constant 0 : index
    %c0_31 = arith.constant 0 : index
    %24 = vector.load %arg3[%c0_30, %c0_31] : memref<1x128xf32, #tpu.memory_space<vmem>>, vector<1x128xf32>
    %25 = vector.broadcast %24 : vector<1x128xf32> to vector<32x128xf32>
    %26 = arith.addf %23, %25 : vector<32x128xf32>
    %cst_32 = arith.constant 0.000000e+00 : f32
    %27 = vector.broadcast %cst_32 : f32 to vector<32x128xf32>
    %28 = arith.maximumf %26, %27 : vector<32x128xf32>
    %29 = vector.shape_cast %28 : vector<32x128xf32> to vector<2x16x128xf32>
    %cst_33 = arith.constant dense<0.000000e+00> : vector<2x128xf32>
    %30 = vector.multi_reduction <add>, %29, %cst_33 [1] : vector<2x16x128xf32> to vector<2x128xf32>
    %c0_34 = arith.constant 0 : index
    %c0_35 = arith.constant 0 : index
    %31 = vector.load %arg4[%c0_34, %c0_35] : memref<128x128xf32, #tpu.memory_space<vmem>>, vector<128x128xf32>
    %cst_36 = arith.constant dense<0.000000e+00> : vector<2x128xf32>
    %32 = tpu.matmul %30, %31, %cst_36 {dimension_numbers = #tpu.dot_dimension_numbers<[1], [0], [0], [1], [0, 0, 1, 1], [], []>} : vector<2x128xf32>, vector<128x128xf32>, vector<2x128xf32> -> vector<2x128xf32>
    %c0_37 = arith.constant 0 : index
    %c0_38 = arith.constant 0 : index
    %33 = vector.load %arg5[%c0_37, %c0_38] : memref<1x128xf32, #tpu.memory_space<vmem>>, vector<1x128xf32>
    %34 = vector.broadcast %33 : vector<1x128xf32> to vector<2x128xf32>
    %35 = arith.addf %32, %34 : vector<2x128xf32>
    %c0_39 = arith.constant 0 : index
    %c0_40 = arith.constant 0 : index
    %36 = vector.load %arg6[%c0_39, %c0_40] : memref<2x128xf32, #tpu.memory_space<vmem>>, vector<2x128xf32>
    tpu.vector_store %arg6[%c0_39, %c0_40], %35 {strides = array<i32>} : memref<2x128xf32, #tpu.memory_space<vmem>>, vector<2x128xf32>,
    return
  }
  func.func @transform_0(%arg0: i32) -> (i32, i32, i32) {
    %c0_i32 = arith.constant 0 : i32
    %c0_i32_0 = arith.constant 0 : i32
    %c0_i32_1 = arith.constant 0 : i32
    return %arg0, %c0_i32, %c0_i32_0 : i32, i32, i32
  }
  func.func @transform_1(%arg0: i32) -> (i32, i32, i32) {
    %c0_i32 = arith.constant 0 : i32
    %c0_i32_0 = arith.constant 0 : i32
    %c0_i32_1 = arith.constant 0 : i32
    %c0_i32_2 = arith.constant 0 : i32
    return %c0_i32, %c0_i32_0, %c0_i32_1 : i32, i32, i32
  }
  func.func @transform_2(%arg0: i32) -> (i32, i32) {
    %c0_i32 = arith.constant 0 : i32
    %c0_i32_0 = arith.constant 0 : i32
    %c0_i32_1 = arith.constant 0 : i32
    return %c0_i32, %c0_i32_0 : i32, i32
  }
  func.func @transform_3(%arg0: i32) -> (i32, i32) {
    %c0_i32 = arith.constant 0 : i32
    %c0_i32_0 = arith.constant 0 : i32
    %c0_i32_1 = arith.constant 0 : i32
    return %c0_i32, %c0_i32_0 : i32, i32
  }
  func.func @transform_4(%arg0: i32) -> (i32, i32) {
    %c0_i32 = arith.constant 0 : i32
    %c0_i32_0 = arith.constant 0 : i32
    %c0_i32_1 = arith.constant 0 : i32
    return %c0_i32, %c0_i32_0 : i32, i32
  }
  func.func @transform_5(%arg0: i32) -> (i32, i32) {
    %c0_i32 = arith.constant 0 : i32
    %c0_i32_0 = arith.constant 0 : i32
    return %arg0, %c0_i32 : i32, i32
  }
}

</mosaic_0001>

<bundles_post_ra>
// kernel: tile.13
= control target key start
LH: loop header
LB: loop body
LE: loop exit
PB: predicated region body
PF: predicated region fallthrough
CT: control target
= control target key end

     0   :  { %s28_s0 = inlined_call_operand.vmem [shape: f32[8], index: 0, kind: input, shape index: {}]   ;;  %s29_s1 = inlined_call_operand.vmem [shape: f32[16,8], index: 1, kind: output, shape index: {}]  }
   0x1   :  { %v4_v0 = vld [vmem:[%s28_s0] ss:$0 sm:$0xff] }
   0x2   :  { %5 = vst [vmem:[%s29_s1] sm:$0xff] %v4_v0 }
   0x3   :  { %8 = vst [vmem:[%s29_s1 + $0x8] sm:$0xff] %v4_v0 }

// kernel: tile.14
= control target key start
LH: loop header
LB: loop body
LE: loop exit
PB: predicated region body
PF: predicated region fallthrough
CT: control target
= control target key end

     0   :  { %s131_s10 = smov 120   ;;  %s132_s11 = smov 104   ;;  %vm3_vm0 = vcmask 64512   ;;  %vm9_vm1 = vcmask 1048512   ;;  %vm15_vm2 = vcmask 982912   ;;  %vm21_vm3 = vcmask 917312   ;;  %s207_s0 = inlined_call_operand.vmem [shape: f32[16,8], index: 0, kind: input, shape index: {}]   ;;  %s208_s1 = inlined_call_operand.vmem [shape: f32[1,128], index: 1, kind: output, shape index: {}]  }
   0x1   :  { %v101_v0 = vld [vmem:[%s207_s0 + $0xf] sm:$0x1]   ;;  %v103_v1 = vld [vmem:[%s207_s0 + $0xd] sm:$0x1]   ;;  %v105_v2 = vld [vmem:[%s207_s0 + $0xb] sm:$0x1]  }
   0x2   :  { %7 = vrot.lane.b32.xlu0 %v101_v0, %s131_s10  ;;  %19 = vrot.lane.b32.xlu1 %v103_v1, %s132_s11  ;;  %s133_s14 = smov 88   ;;  %v102_v3 = vld [vmem:[%s207_s0 + $0xe] sm:$0x1]   ;;  %v104_v4 = vld [vmem:[%s207_s0 + $0xc] sm:$0x1]   ;;  %s134_s19 = smov 112  }
   0x3   :  { %31 = vrot.lane.b32.xlu2 %v105_v2, %s133_s14  ;;  %s135_s20 = smov 96   ;;  %v106_v5 = vld [vmem:[%s207_s0 + $0xa] sm:$0x1]   ;;  %s136_s23 = smov 80   ;;  %v107_v6 = vld [vmem:[%s207_s0 + $0x9] sm:$0x1]  }
   0x4   :  { %v108_v7 = vld [vmem:[%s207_s0 + $0x8] sm:$0x1]   ;;  %s137_s28 = smov 72   ;;  %s138_s29 = smov 64   ;;  %v109_v8 = vld [vmem:[%s207_s0 + $0x7] sm:$0x1]  }
   0x5   :  { %s139_s3 = smov 56   ;;  %v110_v9 = vld [vmem:[%s207_s0 + $0x6] sm:$0x1]   ;;  %v111_v10 = vld [vmem:[%s207_s0 + $0x5] sm:$0x1]   ;;  %s140_s8 = smov 48  }
   0x6   :  { %s141_s9 = smov 40   ;;  %v112_v11 = vld [vmem:[%s207_s0 + $0x4] sm:$0x1]   ;;  %s142_s12 = smov 32   ;;  %v113_v12 = vld [vmem:[%s207_s0 + $0x3] sm:$0x1]  }
   0x7   :  { %v114_v13 = vld [vmem:[%s207_s0 + $0x2] sm:$0x1]   ;;  %s143_s17 = smov 24   ;;  %s144_s18 = smov 16   ;;  %v115_v14 = vld [vmem:[%s207_s0 + $0x1] sm:$0x1]  }
   0x8   :  { %s145_s21 = smov 8   ;;  %v2_v15 = vld [vmem:[%s207_s0] sm:$0x1]   ;;  %vm27_vm4 = vcmask 851712   ;;  %vm33_vm5 = vcmask 786112   ;;  %vm39_vm6 = vcmask 720512  }
   0x9   :  { %4 = vst.msk [vmem:[#allocation0] sm:$0x1] %vm3_vm0, %v2_v15   ;;  %vm45_vm7 = vcmask 654912   ;;  %vm51_vm8 = vcmask 589312   ;;  %vm57_vm9 = vcmask 523712   ;;  %vm63_vm10 = vcmask 458112  }
   0xa   :  { %13 = vrot.lane.b32.xlu0 %v102_v3, %s134_s19  ;;  %25 = vrot.lane.b32.xlu1 %v104_v4, %s135_s20  ;;  %vm69_vm11 = vcmask 392512   ;;  %vm75_vm12 = vcmask 326912   ;;  %vm81_vm13 = vcmask 261312   ;;  %vm87_vm14 = vcmask 195712  }
   0xb   :  { %37 = vrot.lane.b32.xlu2 %v106_v5, %s136_s23  ;;  %vm93_vm15 = vcmask 130112  }
  0x12   :  { %43 = vrot.lane.b32.xlu0 %v107_v6, %s137_s28  ;;  %49 = vrot.lane.b32.xlu1 %v108_v7, %s138_s29 }
  0x13   :  { %55 = vrot.lane.b32.xlu2 %v109_v8, %s139_s3 }
  0x1a   :  { %61 = vrot.lane.b32.xlu0 %v110_v9, %s140_s8  ;;  %67 = vrot.lane.b32.xlu1 %v111_v10, %s141_s9 }
  0x1b   :  { %73 = vrot.lane.b32.xlu2 %v112_v11, %s142_s12 }
  0x22   :  { %79 = vrot.lane.b32.xlu0 %v113_v12, %s143_s17  ;;  %85 = vrot.lane.b32.xlu1 %v114_v13, %s144_s18 }
  0x23   :  { %91 = vrot.lane.b32.xlu2 %v115_v14, %s145_s21 }
  0x5d   :  { %v32_v16 = vpop.permute.xlu2 %31  }
  0x65   :  { %v38_v17 = vpop.permute.xlu2 %37  }
  0x6d   :  { %v56_v18 = vpop.permute.xlu2 %55  }
  0x74   :  { %v8_v19 = vpop.permute.xlu0 %7   ;;  %v20_v20 = vpop.permute.xlu1 %19  }
  0x75   :  { %10 = vst.msk [vmem:[#allocation0] sm:$0x1] %vm9_vm1, %v8_v19   ;;  %v74_v21 = vpop.permute.xlu2 %73  }
  0x7c   :  { %v14_v22 = vpop.permute.xlu0 %13   ;;  %v26_v23 = vpop.permute.xlu1 %25  }
  0x7d   :  { %16 = vst.msk [vmem:[#allocation0] sm:$0x1] %vm15_vm2, %v14_v22   ;;  %v92_v24 = vpop.permute.xlu2 %91  }
  0x7e   :  { %22 = vst.msk [vmem:[#allocation0] sm:$0x1] %vm21_vm3, %v20_v20  }
  0x7f   :  { %28 = vst.msk [vmem:[#allocation0] sm:$0x1] %vm27_vm4, %v26_v23  }
  0x80   :  { %34 = vst.msk [vmem:[#allocation0] sm:$0x1] %vm33_vm5, %v32_v16  }
  0x81   :  { %40 = vst.msk [vmem:[#allocation0] sm:$0x1] %vm39_vm6, %v38_v17  }
  0x84   :  { %v44_v25 = vpop.permute.xlu0 %43   ;;  %v50_v26 = vpop.permute.xlu1 %49  }
  0x85   :  { %46 = vst.msk [vmem:[#allocation0] sm:$0x1] %vm45_vm7, %v44_v25  }
  0x86   :  { %52 = vst.msk [vmem:[#allocation0] sm:$0x1] %vm51_vm8, %v50_v26  }
  0x87   :  { %58 = vst.msk [vmem:[#allocation0] sm:$0x1] %vm57_vm9, %v56_v18  }
  0x8c   :  { %v62_v27 = vpop.permute.xlu0 %61   ;;  %v68_v28 = vpop.permute.xlu1 %67  }
  0x8d   :  { %64 = vst.msk [vmem:[#allocation0] sm:$0x1] %vm63_vm10, %v62_v27  }
  0x8e   :  { %70 = vst.msk [vmem:[#allocation0] sm:$0x1] %vm69_vm11, %v68_v28  }
  0x8f   :  { %76 = vst.msk [vmem:[#allocation0] sm:$0x1] %vm75_vm12, %v74_v21  }
  0x94   :  { %v80_v29 = vpop.permute.xlu0 %79   ;;  %v86_v30 = vpop.permute.xlu1 %85  }
  0x95   :  { %82 = vst.msk [vmem:[#allocation0] sm:$0x1] %vm81_vm13, %v80_v29  }
  0x96   :  { %88 = vst.msk [vmem:[#allocation0] sm:$0x1] %vm87_vm14, %v86_v30  }
  0x97   :  { %94 = vst.msk [vmem:[#allocation0] sm:$0x1] %vm93_vm15, %v92_v24  }
  0x9e   :  { %v97_v31 = vld [vmem:[#allocation0] sm:$0x1] }
  0x9f   :  { %100 = vst [vmem:[%s208_s1] sm:$0x1] %v97_v31 }

// kernel: model_trainer_forward.1
= control target key start
LH: loop header
LB: loop body
LE: loop exit
PB: predicated region body
PF: predicated region fallthrough
CT: control target
= control target key end

     0   :  { %vm21_vm0 = vcmask 516096   ;;  %v346_v5 = vmov 0.0   ;;  %vm30_vm1 = vcmask 523264   ;;  %s539_s0 = inlined_call_operand.vmem [shape: f32[2,16,64], index: 0, kind: input, shape index: {}]   ;;  %s540_s1 = inlined_call_operand.vmem [shape: f32[3,64,128], index: 1, kind: input, shape index: {}]   ;;  %s541_s2 = inlined_call_operand.vmem [shape: f32[1,128], index: 2, kind: input, shape index: {}]   ;;  %s542_s3 = inlined_call_operand.vmem [shape: f32[128,128], index: 3, kind: input, shape index: {}]   ;;  %s543_s4 = inlined_call_operand.vmem [shape: f32[1,128], index: 4, kind: input, shape index: {}]   ;;  %s544_s5 = inlined_call_operand.hbm [shape: f32[2,128], index: 5, kind: output, shape index: {}]  }
   0x1   :  { %v311_v0 = vld [vmem:[%s540_s1 + $0xb8] sm:$0xff]  ;;  %v310_v1 = vld [vmem:[%s540_s1 + $0xb0] sm:$0xff]  ;;  %22 = vst.msk [vmem:[#allocation2] sm:$0x1] %vm21_vm0, %v346_v5  ;;  %v309_v6 = vld [vmem:[%s540_s1 + $0xa8] sm:$0xff] }
   0x2   :  { %v295_v2 = vld [vmem:[%s540_s1 + $0x78] sm:$0xff]  ;;  %175 = vmatpush.msra.mxu2 %v311_v0  ;;  %v294_v4 = vld [vmem:[%s540_s1 + $0x70] sm:$0xff]  ;;  %v293_v8 = vld [vmem:[%s540_s1 + $0x68] sm:$0xff]  ;;  %23 = vst.msk [vmem:[#allocation2 + $0x18] sm:$0x1] %vm21_vm0, %v346_v5 }
   0x3   :  { %80 = vmatpush.msra.mxu0 %v295_v2  ;;  %v46_v3 = vld [vmem:[%s540_s1 + $0x38] sm:$0xff]  ;;  %v45_v7 = vld [vmem:[%s540_s1 + $0x30] sm:$0xff]  ;;  %v44_v9 = vld [vmem:[%s540_s1 + $0x28] sm:$0xff]  ;;  %24 = vst.msk [vmem:[#allocation2 + $0x11] sm:$0x1] %vm21_vm0, %v346_v5 }
   0x4   :  { %121 = vmatpush.msra.mxu1 %v46_v3  ;;  %176 = vmatpush.msra.mxu2 %v310_v1  ;;  %v308_v10 = vld [vmem:[%s540_s1 + $0xa0] sm:$0xff]  ;;  %25 = vst.msk [vmem:[#allocation2 + $0x29] sm:$0x1] %vm21_vm0, %v346_v5  ;;  %v307_v13 = vld [vmem:[%s540_s1 + $0x98] sm:$0xff]  ;;  %v306_v16 = vld [vmem:[%s540_s1 + $0x90] sm:$0xff] }
   0x5   :  { %81 = vmatpush.msra.mxu0 %v294_v4  ;;  %v292_v11 = vld [vmem:[%s540_s1 + $0x60] sm:$0xff]  ;;  %v291_v14 = vld [vmem:[%s540_s1 + $0x58] sm:$0xff]  ;;  %v27_v18 = vld [vmem:[%s539_s0 + $0x8] sm:$0xff] }
   0x6   :  { %122 = vmatpush.msra.mxu1 %v45_v7  ;;  %177 = vmatpush.msra.mxu2 %v309_v6  ;;  %v43_v12 = vld [vmem:[%s540_s1 + $0x20] sm:$0xff]  ;;  %v42_v17 = vld [vmem:[%s540_s1 + $0x18] sm:$0xff]  ;;  %v290_v19 = vld [vmem:[%s540_s1 + $0x50] sm:$0xff]  ;;  %32 = vst.msk [vmem:[#allocation2 + $0x9] sm:$0xff] %vm30_vm1, %v27_v18 }
   0x7   :  { %82 = vmatpush.msra.mxu0 %v293_v8  ;;  %v26_v15 = vld [vmem:[%s539_s0] sm:$0xff]  ;;  %v41_v20 = vld [vmem:[%s540_s1 + $0x10] sm:$0xff]  ;;  %v29_v22 = vld [vmem:[%s539_s0 + $0x18] sm:$0xff] }
   0x8   :  { %123 = vmatpush.msra.mxu1 %v44_v9  ;;  %178 = vmatpush.msra.mxu2 %v308_v10  ;;  %31 = vst.msk [vmem:[#allocation2 + $0x1] sm:$0xff] %vm30_vm1, %v26_v15  ;;  %v28_v21 = vld [vmem:[%s539_s0 + $0x10] sm:$0xff]  ;;  %v305_v23 = vld [vmem:[%s540_s1 + $0x88] sm:$0xff] }
   0x9   :  { %83 = vmatpush.msra.mxu0 %v292_v11  ;;  %33 = vst.msk [vmem:[#allocation2 + $0x19] sm:$0xff] %vm30_vm1, %v28_v21  ;;  %v289_v24 = vld [vmem:[%s540_s1 + $0x48] sm:$0xff] }
   0xa   :  { %124 = vmatpush.msra.mxu1 %v43_v12  ;;  %179 = vmatpush.msra.mxu2 %v307_v13  ;;  %34 = vst.msk [vmem:[#allocation2 + $0x21] sm:$0xff] %vm30_vm1, %v29_v22 }
   0xb   :  { %84 = vmatpush.msra.mxu0 %v291_v14 }
   0xc   :  { %125 = vmatpush.msra.mxu1 %v42_v17 }
   0xd   :  { %10 = vsyncpa [#allocation4], 0  ;;  %180 = vmatpush.msra.mxu2 %v306_v16  ;;  %85 = vmatpush.msra.mxu0 %v290_v19  ;;  %v40_v25 = vld [vmem:[%s540_s1 + $0x8] sm:$0xff]  ;;  %v304_v26 = vld [vmem:[%s540_s1 + $0x80] sm:$0xff]  ;;  %vm248_vm2 = vcmask 1041409   ;;  %s347_s29 = smov [#allocation3]  }
   0xe   :  { %126 = vmatpush.msra.mxu1 %v41_v20  ;;  %v288_v27 = vld [vmem:[%s540_s1 + $0x40] sm:$0xff]  ;;  %v143_v32 = vld [vmem:[#allocation2 + $0xa] sm:$0xff]  ;;  %v241_v41 = vld [vmem:[%s542_s3 + $0x78] sm:$0xff]  ;;  %s277_s30 = sshll.u32 %s347_s29, 4  ;;  %s279_s8 = sshll.u32 %s544_s5, 4  ;;  %s278_s30 = int_to_ptr.vmem [resolvable:$true] %s277_s30  ;;  %s280_s8 = int_to_ptr.hbm [resolvable:$true] %s279_s8 }
   0xf   :  { %181 = vmatpush.msra.mxu2 %v305_v23  ;;  %86 = vmatpush.msra.mxu0 %v289_v24  ;;  %v39_v28 = vld [vmem:[%s540_s1] sm:$0xff]  ;;  %v48_v33 = vld [vmem:[#allocation2 + $0x9] sm:$0xff]  ;;  %v237_v45 = vld [vmem:[%s542_s3 + $0x58] sm:$0xff] }
  0x10   :  { %127 = vmatpush.msra.mxu1 %v40_v25  ;;  %v47_v29 = vld [vmem:[#allocation2 + $0x1] sm:$0xff]  ;;  %v49_v36 = vld [vmem:[#allocation2 + $0x19] sm:$0xff]  ;;  %251 = vmatpush.msra.mxu3 %v241_v41  ;;  %v240_v42 = vld [vmem:[%s542_s3 + $0x70] sm:$0xff] }
  0x11   :  { %v35_v30 = vld [vmem:[#allocation2] sm:$0xff]  ;;  %182 = vmatpush.msra.mxu2 %v304_v26  ;;  %87 = vmatpush.msra.mxu0 %v288_v27  ;;  %v36_v34 = vld [vmem:[#allocation2 + $0x8] sm:$0xff]  ;;  %v37_v37 = vld [vmem:[#allocation2 + $0x18] sm:$0xff] }
  0x12   :  { %v142_v31 = vld [vmem:[#allocation2 + $0x2] sm:$0xff]  ;;  %128 = vmatpush.msra.mxu1 %v39_v28  ;;  %296 = vmatmul.msk.f32.vlgmr.msra.gmra.mxu0 %vm30_vm1, %v47_v29  ;;  %v144_v35 = vld [vmem:[#allocation2 + $0x1a] sm:$0xff]  ;;  %v236_v46 = vld [vmem:[%s542_s3 + $0x50] sm:$0xff] }
  0x13   :  { %312 = vmatmul.msk.f32.vlgmr.msra.gmra.mxu2 %vm30_vm1, %v142_v31  ;;  %300 = vmatmul.msk.f32.vlgmr.msra.gmra.mxu1 %vm30_vm1, %v35_v30  ;;  %v145_v38 = vld [vmem:[#allocation2 + $0x22] sm:$0xff]  ;;  %v233_v51 = vld [vmem:[%s542_s3 + $0x38] sm:$0xff]  ;;  %v232_v53 = vld [vmem:[%s542_s3 + $0x30] sm:$0xff] }
  0x14   :  { %v50_v39 = vld [vmem:[#allocation2 + $0x21] sm:$0xff]  ;;  %252 = vmatpush.msra.mxu3 %v240_v42  ;;  %v229_v58 = vld [vmem:[%s542_s3 + $0x18] sm:$0xff]  ;;  %v228_v61 = vld [vmem:[%s542_s3 + $0x10] sm:$0xff] }
  0x15   :  { %v38_v40 = vld [vmem:[#allocation2 + $0x20] sm:$0xff]  ;;  %v239_v43 = vld [vmem:[%s542_s3 + $0x68] sm:$0xff] }
  0x16   :  { %253 = vmatpush.msra.mxu3 %v239_v43  ;;  %v238_v44 = vld [vmem:[%s542_s3 + $0x60] sm:$0xff]  ;;  %v235_v47 = vld [vmem:[%s542_s3 + $0x48] sm:$0xff] }
  0x17   :  { %v234_v50 = vld [vmem:[%s542_s3 + $0x40] sm:$0xff]  ;;  %v231_v54 = vld [vmem:[%s542_s3 + $0x28] sm:$0xff] }
  0x18   :  { %254 = vmatpush.msra.mxu3 %v238_v44  ;;  %v230_v57 = vld [vmem:[%s542_s3 + $0x20] sm:$0xff]  ;;  %v227_v63 = vld [vmem:[%s542_s3 + $0x8] sm:$0xff] }
  0x19   :  { %v318_v1 = vld [vmem:[%s541_s2] ss:$0 sm:$0xff] }
  0x1a   :  { %297 = vmatmul.msk.f32.gmra.mxu0 %vm30_vm1, %v48_v33  ;;  %255 = vmatpush.msra.mxu3 %v237_v45  ;;  %v226_v3 = vld [vmem:[%s542_s3] sm:$0xff] }
  0x1b   :  { %313 = vmatmul.msk.f32.gmra.mxu2 %vm30_vm1, %v143_v32  ;;  %301 = vmatmul.msk.f32.gmra.mxu1 %vm30_vm1, %v36_v34 }
  0x1c   :  { %256 = vmatpush.msra.mxu3 %v236_v46 }
  0x1e   :  { %257 = vmatpush.msra.mxu3 %v235_v47 }
  0x20   :  { %258 = vmatpush.msra.mxu3 %v234_v50 }
  0x22   :  { %298 = vmatmul.msk.f32.gmra.mxu0 %vm30_vm1, %v49_v36  ;;  %259 = vmatpush.msra.mxu3 %v233_v51 }
  0x23   :  { %314 = vmatmul.msk.f32.gmra.mxu2 %vm30_vm1, %v144_v35  ;;  %302 = vmatmul.msk.f32.gmra.mxu1 %vm30_vm1, %v37_v37  ;;  %v319_v37 = vld [vmem:[%s543_s4] ss:$0 sm:$0xff] }
  0x24   :  { %260 = vmatpush.msra.mxu3 %v232_v53 }
  0x26   :  { %261 = vmatpush.msra.mxu3 %v231_v54 }
  0x28   :  { %262 = vmatpush.msra.mxu3 %v230_v57 }
  0x2a   :  { %299 = vmatmul.msk.f32.gmra.mxu0 %vm30_vm1, %v50_v39  ;;  %263 = vmatpush.msra.mxu3 %v229_v58 }
  0x2b   :  { %315 = vmatmul.msk.f32.gmra.mxu2 %vm30_vm1, %v145_v38  ;;  %303 = vmatmul.msk.f32.gmra.mxu1 %vm30_vm1, %v38_v40 }
  0x2c   :  { %264 = vmatpush.msra.mxu3 %v228_v61 }
  0x2e   :  { %265 = vmatpush.msra.mxu3 %v227_v63 }
  0x30   :  { %266 = vmatpush.msra.mxu3 %v226_v3 }
  0x8f   :  { %v89_v48 = vpop.f32.mrf.mxu0 }
  0x90   :  { %v130_v49 = vpop.f32.mrf.mxu1 }
  0x91   :  { %v131_v59 = vadd.f32 %v130_v49, %v89_v48 }
  0x96   :  { %v184_v52 = vpop.f32.mrf.mxu2 }
  0x97   :  { %v92_v55 = vpop.f32.mrf.mxu0  ;;  %v196_v0 = vadd.f32 %v184_v52, %v131_v59 }
  0x98   :  { %v133_v56 = vpop.f32.mrf.mxu1 }
  0x99   :  { %v134_v60 = vadd.f32 %v133_v56, %v92_v55  ;;  %v204_v7 = vadd.f32 %v318_v1, %v196_v0 }
  0x9b   :  { %v208_v10 = vmax.f32 %v204_v7, 0.0 }
  0x9e   :  { %v187_v62 = vpop.f32.mrf.mxu2 }
  0x9f   :  { %v197_v2 = vadd.f32 %v187_v62, %v134_v60  ;;  %v95_v5 = vpop.f32.mrf.mxu0 }
  0xa0   :  { %v136_v6 = vpop.f32.mrf.mxu1 }
  0xa1   :  { %v205_v4 = vadd.f32 %v318_v1, %v197_v2  ;;  %v137_v11 = vadd.f32 %v136_v6, %v95_v5 }
  0xa3   :  { %v209_v8 = vmax.f32 %v205_v4, 0.0 }
  0xa5   :  { %v212_v12 = vadd.f32 %v209_v8, %v208_v10 }
  0xa6   :  { %v190_v9 = vpop.f32.mrf.mxu2 }
  0xa7   :  { %v98_v13 = vpop.f32.mrf.mxu0  ;;  %v198_v15 = vadd.f32 %v190_v9, %v137_v11  ;;  %v213_v17 = vrot.slane %v212_v12, 4 }
  0xa8   :  { %v139_v14 = vpop.f32.mrf.mxu1 }
  0xa9   :  { %v140_v16 = vadd.f32 %v139_v14, %v98_v13  ;;  %v206_v19 = vadd.f32 %v318_v1, %v198_v15  ;;  %v214_v21 = vadd.f32 %v213_v17, %v212_v12 }
  0xab   :  { %v210_v23 = vmax.f32 %v206_v19, 0.0  ;;  %v215_v26 = vrot.slane %v214_v21, 2 }
  0xad   :  { %v216_v29 = vadd.f32 %v215_v26, %v214_v21 }
  0xae   :  { %v193_v18 = vpop.f32.mrf.mxu2 }
  0xaf   :  { %v199_v20 = vadd.f32 %v193_v18, %v140_v16  ;;  %v217_v31 = vrot.slane %v216_v29, 1 }
  0xb1   :  { %v207_v22 = vadd.f32 %v318_v1, %v199_v20  ;;  %v218_v34 = vadd.f32 %v217_v31, %v216_v29 }
  0xb3   :  { %v211_v24 = vmax.f32 %v207_v22, 0.0 }
  0xb5   :  { %v219_v25 = vadd.f32 %v211_v24, %v210_v23 }
  0xb7   :  { %v220_v27 = vrot.slane %v219_v25, 4 }
  0xb9   :  { %v221_v28 = vadd.f32 %v220_v27, %v219_v25 }
  0xbb   :  { %v222_v30 = vrot.slane %v221_v28, 2 }
  0xbd   :  { %v223_v32 = vadd.f32 %v222_v30, %v221_v28 }
  0xbf   :  { %v224_v33 = vrot.slane %v223_v32, 1 }
  0xc1   :  { %v225_v35 = vadd.f32 %v224_v33, %v223_v32 }
  0xc3   :  { %v249_v36 = vsel %vm248_vm2, %v225_v35, %v218_v34 }
  0xc4   :  { %267 = vmatmul.f32.vlgmr.msra.gmra.mxu3 %v249_v36 }
 0x147   :  { %v268_v38 = vpop.f32.mrf.mxu3 }
 0x148   :  { %v269_v39 = vadd.f32 %v319_v37, %v268_v38 }
 0x14a   :  { %271 = vst [vmem:[#allocation3] sm:$0x3] %v269_v39 }
 0x14b   :  { %282 = dma.vmem_to_hbm [thread:$0]  %s278_s30, 32, %s280_s8, [#allocation4]  }
 0x14c   :  { %344 = dma.done.wait [#allocation4], 32  }
 0x14d   :  { %345 = vsyncadd [#allocation4], 4294967264 }
 0x14e   :  { %287 = vsyncpa [#allocation4], 1 }

</bundles_post_ra>
